<compile_context>
chip_gen: v6e
topology: v6e:2x2x1
jax: 0.10.0
libtpu: 0.0.40
codegen_flags: <defaults>
</compile_context>

<pallas_src>
import math
from functools import partial

import jax
import jax.numpy as jnp
from jax.experimental import pallas as pl
from jax.experimental.pallas import tpu as pltpu


def _mlp_kernel(precision, xT_ref, w1_ref, w2_ref, b2_ref, w3_ref, b3_ref, o_ref):
    # Transposed, lane-dense layout: batch maps to the 128-wide lane axis.
    #   xT_ref : (8, TB)   7 real features + constant-1 "bias feature" row (sublane 7)
    #   w1_ref : (32, 8)   PyTorch-native (out, in); b1 folded into column 7
    #   w2_ref : (32, 32)
    #   b2_ref : (32, 1)
    #   w3_ref : (32, 1)
    #   b3_ref : (1,)      scalar, lives in SMEM
    #   o_ref  : (1, TB)
    xT = xT_ref[...]

    # Layer 1 (+ b1 via the constant-1 feature row) + ReLU.      (32, TB)
    h1 = jnp.dot(w1_ref[...], xT,
                 preferred_element_type=jnp.float32, precision=precision)
    h1 = jnp.maximum(h1, 0.0)

    # Layer 2 + b2 + ReLU.                                        (32, TB)
    h2 = jnp.dot(w2_ref[...], h1,
                 preferred_element_type=jnp.float32, precision=precision)
    h2 = jnp.maximum(h2 + b2_ref[...], 0.0)

    # Final 32 -> 1 layer on the VPU: broadcast multiply + sublane reduce.
    # Avoids a near-empty M=1 MXU pass; VPU/XLU have ample slack here.
    out = jnp.sum(w3_ref[...] * h2, axis=0, keepdims=True) + b3_ref[0]   # (1, TB)
    o_ref[...] = out.astype(o_ref.dtype)


def _batch_dim_semantics():
    """Grid semantics for the batch axis.

    Only CORE_PARALLEL actually shards the grid across v7x's 2 TensorCores;
    on single-TC chips (v5e/v6e) plain "parallel" is the proven-safe choice
    (measured: parallel vs arbitrary makes no codegen difference there)."""
    try:
        kind = jax.devices()[0].device_kind.lower()
    except Exception:
        return ("parallel",)
    if "v7" in kind or "7x" in kind:
        return (pltpu.CORE_PARALLEL,)
    return ("parallel",)


def neural_network_forward(x, params, *, tb_max=32768, target_tiles=4, precision=None):
    """Forward pass of the Warfarin NeuralNetwork (7 -> 32 -> 32 -> 1 MLP).

    x: (batch, 7) float32
    params: PyTorch-native shapes:
        w1 (32, 7), b1 (32,), w2 (32, 32), b2 (32,), w3 (1, 32), b3 (1,)
    precision: optional jax.lax.Precision for the two MXU matmuls
        (use Precision.HIGHEST for closest parity with PyTorch float32).
    Returns (batch, 1) float32, matching PyTorch's `self.net(x)`.
    """
    batch, feat = x.shape
    assert feat == 7, f"expected 7 input features, got {feat}"

    lane = 128
    # Batch tile: lane-multiple, sized from batch so the grid has >= target_tiles
    # steps (keeps both v7x TensorCores fed and the DMA pipeline rolling), capped
    # at tb_max so large batches still amortize the ~0.35us per-step overhead
    # over ~1 MiB of streamed data.
    tb = pl.cdiv(max(batch, 1), target_tiles)
    tb = pl.cdiv(tb, lane) * lane
    tb = max(lane, min(tb_max, tb))
    pb = pl.cdiv(batch, tb) * tb                     # padded batch (multiple of tb)

    # ---- layout plumbing: ONE fused pad(transpose) op ---------------------------
    # Row 7 (the padded feature) is constant 1.0 -> carries b1 through the matmul.
    # Padded batch columns are also 1.0; their (garbage) outputs are sliced off below.
    xT = jnp.pad(x.astype(jnp.float32).T, ((0, 1), (0, pb - batch)),
                 constant_values=1.0)                # (8, pb)

    # Fold b1 into w1 as the 8th input column (pairs with the constant-1 row of xT).
    w1p = jnp.concatenate(
        [params["w1"].astype(jnp.float32),
         params["b1"].astype(jnp.float32).reshape(32, 1)], axis=1)      # (32, 8)
    w2 = params["w2"].astype(jnp.float32)                               # (32, 32)
    b2 = params["b2"].reshape(32, 1).astype(jnp.float32)                # (32, 1)
    w3 = params["w3"].reshape(32, 1).astype(jnp.float32)                # (1,32)->(32,1)
    b3 = params["b3"].reshape(1).astype(jnp.float32)                    # scalar -> SMEM

    grid = (pb // tb,)

    # Right-size the scoped VMEM limit: ~2x the worst-case per-tile working set
    # (double-buffered xT + out tiles plus ~5 (32, tb) f32 temporaries), clamped to
    # [16 MiB, 48 MiB] so it stays comfortably under v7x's 64 MiB physical VMEM.
    est_bytes = 4 * (8 * tb * 4) + 5 * (32 * tb * 4)
    vmem_limit = int(min(48 * 1024 * 1024, max(16 * 1024 * 1024, 2 * est_bytes)))

    outT = pl.pallas_call(
        partial(_mlp_kernel, precision),
        out_shape=jax.ShapeDtypeStruct((1, pb), jnp.float32),
        grid=grid,
        in_specs=[
            pl.BlockSpec((8, tb), lambda i: (0, i)),        # xT: streamed along batch/lanes
            pl.BlockSpec((32, 8), lambda i: (0, 0)),        # w1 (+b1 folded): resident
            pl.BlockSpec((32, 32), lambda i: (0, 0)),       # w2: resident
            pl.BlockSpec((32, 1), lambda i: (0, 0)),        # b2: resident
            pl.BlockSpec((32, 1), lambda i: (0, 0)),        # w3: resident
            pl.BlockSpec(memory_space=pltpu.MemorySpace.SMEM),  # b3 scalar in SMEM
        ],
        out_specs=pl.BlockSpec((1, tb), lambda i: (0, i)),  # lane-dense output tile
        compiler_params=pltpu.CompilerParams(
            dimension_semantics=_batch_dim_semantics(),     # CORE_PARALLEL on v7x
            vmem_limit_bytes=vmem_limit,
        ),
    )(xT, w1p, w2, b2, w3, b3)

    # Slice off batch padding and return PyTorch-shaped (batch, 1).
    return outT[:, :batch].T


def init_params(key):
    """Deterministic init mimicking PyTorch nn.Linear defaults
    (uniform(-1/sqrt(fan_in), 1/sqrt(fan_in)) for both weight and bias).
    Shapes match PyTorch: weight (out, in), bias (out,)."""
    def linear(key, fan_in, fan_out):
        kw, kb = jax.random.split(key)
        bound = 1.0 / math.sqrt(fan_in)
        w = jax.random.uniform(kw, (fan_out, fan_in), jnp.float32, -bound, bound)
        b = jax.random.uniform(kb, (fan_out,), jnp.float32, -bound, bound)
        return w, b

    k1, k2, k3 = jax.random.split(key, 3)
    w1, b1 = linear(k1, 7, 32)
    w2, b2 = linear(k2, 32, 32)
    w3, b3 = linear(k3, 32, 1)
    return {"w1": w1, "b1": b1, "w2": w2, "b2": b2, "w3": w3, "b3": b3}


def _reference_forward(x, p, precision=None):
    # Plain-JAX reference, identical math to PyTorch nn.Sequential.
    h1 = jnp.maximum(jnp.dot(x, p["w1"].T, precision=precision) + p["b1"], 0.0)
    h2 = jnp.maximum(jnp.dot(h1, p["w2"].T, precision=precision) + p["b2"], 0.0)
    return jnp.dot(h2, p["w3"].T, precision=precision) + p["b3"]


if __name__ == "__main__":
    key = jax.random.PRNGKey(0)
    k_params, k_x1, k_x2 = jax.random.split(key, 3)

    params = init_params(k_params)

    # Warfarin features: 7 input columns per patient (batch = 8 patients).
    x_small = jax.random.normal(k_x1, (8, 7), dtype=jnp.float32)
    out_small = jax.block_until_ready(neural_network_forward(x_small, params))
    ref_small = _reference_forward(x_small, params)
    assert out_small.shape == (8, 1), out_small.shape
    assert jnp.allclose(out_small, ref_small, atol=1e-5, rtol=1e-5), "mismatch (batch=8)"

    # Non-lane-aligned batch: exercises a multi-step grid plus the padding/slicing path.
    x_ragged = jax.random.normal(k_x2, (200, 7), dtype=jnp.float32)
    out_ragged = jax.block_until_ready(neural_network_forward(x_ragged, params))
    ref_ragged = _reference_forward(x_ragged, params)
    assert out_ragged.shape == (200, 1), out_ragged.shape
    assert jnp.allclose(out_ragged, ref_ragged, atol=1e-5, rtol=1e-5), "mismatch (batch=200)"

    print("KERNEL_OK")
</pallas_src>

<mosaic_0001>
module attributes {stable_mosaic.version = 11 : i64} {
  func.func @_mlp_kernel(%arg0: i32, %arg1: memref<8x128xf32, #tpu.memory_space<vmem>>, %arg2: memref<32x8xf32, #tpu.memory_space<vmem>>, %arg3: memref<32x32xf32, #tpu.memory_space<vmem>>, %arg4: memref<32x1xf32, #tpu.memory_space<vmem>>, %arg5: memref<32x1xf32, #tpu.memory_space<vmem>>, %arg6: memref<1xf32, #tpu.memory_space<smem>>, %arg7: memref<1x128xf32, #tpu.memory_space<vmem>>) attributes {dimension_semantics = [#tpu.dimension_semantics<parallel>], iteration_bounds = array<i64: 1>, scalar_prefetch = 0 : i64, scratch_operands = 0 : i64, tpu.core_type = #tpu.core_type<tc>, window_params = [{transform_indices = @transform_0, window_bounds = array<i64: 8, 128>}, {pipeline_mode = #tpu.pipeline_mode<synchronous>, transform_indices = @transform_1, window_bounds = array<i64: 32, 8>}, {pipeline_mode = #tpu.pipeline_mode<synchronous>, transform_indices = @transform_2, window_bounds = array<i64: 32, 32>}, {pipeline_mode = #tpu.pipeline_mode<synchronous>, transform_indices = @transform_3, window_bounds = array<i64: 32, 1>}, {pipeline_mode = #tpu.pipeline_mode<synchronous>, transform_indices = @transform_4, window_bounds = array<i64: 32, 1>}, {transform_indices = @transform_5, window_bounds = array<i64: 1>}, {transform_indices = @transform_6, window_bounds = array<i64: 1, 128>}]} {
    %c0 = arith.constant 0 : index
    %c0_0 = arith.constant 0 : index
    %0 = vector.load %arg1[%c0, %c0_0] : memref<8x128xf32, #tpu.memory_space<vmem>>, vector<8x128xf32>
    %c0_1 = arith.constant 0 : index
    %c0_2 = arith.constant 0 : index
    %1 = vector.load %arg2[%c0_1, %c0_2] : memref<32x8xf32, #tpu.memory_space<vmem>>, vector<32x8xf32>
    %cst = arith.constant dense<0.000000e+00> : vector<32x128xf32>
    %2 = tpu.matmul %1, %0, %cst {dimension_numbers = #tpu.dot_dimension_numbers<[1], [0], [0], [1], [0, 0, 1, 1], [], []>} : vector<32x8xf32>, vector<8x128xf32>, vector<32x128xf32> -> vector<32x128xf32>
    %cst_3 = arith.constant 0.000000e+00 : f32
    %3 = vector.broadcast %cst_3 : f32 to vector<32x128xf32>
    %4 = arith.maximumf %2, %3 : vector<32x128xf32>
    %c0_4 = arith.constant 0 : index
    %c0_5 = arith.constant 0 : index
    %5 = vector.load %arg3[%c0_4, %c0_5] : memref<32x32xf32, #tpu.memory_space<vmem>>, vector<32x32xf32>
    %cst_6 = arith.constant dense<0.000000e+00> : vector<32x128xf32>
    %6 = tpu.matmul %5, %4, %cst_6 {dimension_numbers = #tpu.dot_dimension_numbers<[1], [0], [0], [1], [0, 0, 1, 1], [], []>} : vector<32x32xf32>, vector<32x128xf32>, vector<32x128xf32> -> vector<32x128xf32>
    %c0_7 = arith.constant 0 : index
    %c0_8 = arith.constant 0 : index
    %7 = vector.load %arg4[%c0_7, %c0_8] : memref<32x1xf32, #tpu.memory_space<vmem>>, vector<32x1xf32>
    %8 = vector.broadcast %7 : vector<32x1xf32> to vector<32x128xf32>
    %9 = arith.addf %6, %8 : vector<32x128xf32>
    %cst_9 = arith.constant 0.000000e+00 : f32
    %10 = vector.broadcast %cst_9 : f32 to vector<32x128xf32>
    %11 = arith.maximumf %9, %10 : vector<32x128xf32>
    %c0_10 = arith.constant 0 : index
    %c0_11 = arith.constant 0 : index
    %12 = vector.load %arg5[%c0_10, %c0_11] : memref<32x1xf32, #tpu.memory_space<vmem>>, vector<32x1xf32>
    %13 = vector.broadcast %12 : vector<32x1xf32> to vector<32x128xf32>
    %14 = arith.mulf %13, %11 : vector<32x128xf32>
    %cst_12 = arith.constant dense<0.000000e+00> : vector<128xf32>
    %15 = vector.multi_reduction <add>, %14, %cst_12 [0] : vector<32x128xf32> to vector<128xf32>
    %16 = vector.shape_cast %15 : vector<128xf32> to vector<1x128xf32>
    %c0_13 = arith.constant 0 : index
    %17 = memref.load %arg6[%c0_13] : memref<1xf32, #tpu.memory_space<smem>>
    %18 = vector.broadcast %17 : f32 to vector<1x128xf32>
    %19 = arith.addf %16, %18 : vector<1x128xf32>
    %c0_14 = arith.constant 0 : index
    %c0_15 = arith.constant 0 : index
    %20 = vector.load %arg7[%c0_14, %c0_15] : memref<1x128xf32, #tpu.memory_space<vmem>>, vector<1x128xf32>
    tpu.vector_store %arg7[%c0_14, %c0_15], %19 {strides = array<i32>} : memref<1x128xf32, #tpu.memory_space<vmem>>, vector<1x128xf32>,
    return
  }
  func.func @transform_0(%arg0: i32) -> (i32, i32) {
    %c0_i32 = arith.constant 0 : i32
    %c0_i32_0 = arith.constant 0 : i32
    return %c0_i32, %arg0 : i32, i32
  }
  func.func @transform_1(%arg0: i32) -> (i32, i32) {
    %c0_i32 = arith.constant 0 : i32
    %c0_i32_0 = arith.constant 0 : i32
    %c0_i32_1 = arith.constant 0 : i32
    return %c0_i32, %c0_i32_0 : i32, i32
  }
  func.func @transform_2(%arg0: i32) -> (i32, i32) {
    %c0_i32 = arith.constant 0 : i32
    %c0_i32_0 = arith.constant 0 : i32
    %c0_i32_1 = arith.constant 0 : i32
    return %c0_i32, %c0_i32_0 : i32, i32
  }
  func.func @transform_3(%arg0: i32) -> (i32, i32) {
    %c0_i32 = arith.constant 0 : i32
    %c0_i32_0 = arith.constant 0 : i32
    %c0_i32_1 = arith.constant 0 : i32
    return %c0_i32, %c0_i32_0 : i32, i32
  }
  func.func @transform_4(%arg0: i32) -> (i32, i32) {
    %c0_i32 = arith.constant 0 : i32
    %c0_i32_0 = arith.constant 0 : i32
    %c0_i32_1 = arith.constant 0 : i32
    return %c0_i32, %c0_i32_0 : i32, i32
  }
  func.func @transform_5(%arg0: i32) -> i32 {
    %c0_i32 = arith.constant 0 : i32
    %c0_i32_0 = arith.constant 0 : i32
    return %c0_i32 : i32
  }
  func.func @transform_6(%arg0: i32) -> (i32, i32) {
    %c0_i32 = arith.constant 0 : i32
    %c0_i32_0 = arith.constant 0 : i32
    return %c0_i32, %arg0 : i32, i32
  }
}

</mosaic_0001>

<bundles_post_ra>
// kernel: tpu_custom_call.1
= control target key start
LH: loop header
LB: loop body
LE: loop exit
PB: predicated region body
PF: predicated region fallthrough
CT: control target
= control target key end

     0   :  { %vm30_vm0 = vcmask 64512   ;;  %s492_s0 = inlined_call_operand.vmem [shape: f32[8,128], index: 0, kind: input, shape index: {}]   ;;  %s493_s1 = inlined_call_operand.vmem [shape: f32[32,8], index: 1, kind: input, shape index: {}]   ;;  %s494_s2 = inlined_call_operand.vmem [shape: f32[32,32], index: 2, kind: input, shape index: {}]   ;;  %s495_s3 = inlined_call_operand.vmem [shape: f32[32,1], index: 3, kind: input, shape index: {}]   ;;  %s496_s4 = inlined_call_operand.vmem [shape: f32[32,1], index: 4, kind: input, shape index: {}]   ;;  %s497_s5 = inlined_call_operand.<no memory space> [shape: f32[1], index: 5, kind: input, shape index: {}]   ;;  %s498_s6 = inlined_call_operand.hbm [shape: f32[1,128], index: 6, kind: output, shape index: {}]  }
   0x1   :  { %v25_v0 = vld [vmem:[%s492_s0] sm:$0xff]  ;;  %v27_v2 = vld [vmem:[%s493_s1 + $0x8] sm:$0xff]  ;;  %v28_v3 = vld [vmem:[%s493_s1 + $0x10] sm:$0xff] }
   0x2   :  { %v26_v1 = vld [vmem:[%s493_s1] sm:$0xff]  ;;  %338 = vmatprep.subr.mxu0 %v25_v0 }
   0x3   :  { %340 = vmatprep.mubr.msk.f32.mxu0 %vm30_vm0, %v26_v1 }
   0x4   :  { %12 = vsyncpa [#allocation4], 0  ;;  %339 = vmatpush3.msra.mxu0 %v25_v0  ;;  %v29_v4 = vld [vmem:[%s493_s1 + $0x18] sm:$0xff]  ;;  %v132_v5 = vld [vmem:[%s494_s2] sm:$0xff]  ;;  %vm160_vm1 = vcmask 261120   ;;  %v394_v9 = vmov 0   ;;  %v300_v58 = vstv %s497_s5 }
   0x5   :  { %341 = vmatmul.mubr.msk.f32.vlgmr.msra.gmra.mxu0 %vm30_vm0, %v27_v2  ;;  %v134_v6 = vld [vmem:[%s494_s2 + $0x10] sm:$0xff]  ;;  %v136_v7 = vld [vmem:[%s495_s3] sm:$0xff]  ;;  %370 = vset.pattern.permute.xlu0 %v394_v9  ;;  %v137_v10 = vld [vmem:[%s495_s3 + $0x8] sm:$0xff]  ;;  %s395_s28 = smov [#allocation3]  }
   0x6   :  { %343 = vmatprep.mubr.msk.f32.mxu0 %vm30_vm0, %v28_v3  ;;  %357 = vmatprep.mubr.msk.f32.mxu1 %vm160_vm1, %v134_v6  ;;  %v138_v8 = vld [vmem:[%s495_s3 + $0x10] sm:$0xff]  ;;  %v139_v11 = vld [vmem:[%s495_s3 + $0x18] sm:$0xff]  ;;  %v262_v12 = vld [vmem:[%s496_s4] sm:$0xff]  ;;  %s309_s0 = sshll.u32 %s395_s28, 4  ;;  %s310_s0 = int_to_ptr.vmem [resolvable:$true] %s309_s0 }
   0x7   :  { %371 = vset.pattern.permute.xlu1 %v394_v9  ;;  %142 = vperm.xlu0 %370, %v136_v7   ;;  %v263_v13 = vld [vmem:[%s496_s4 + $0x8] sm:$0xff]  ;;  %v264_v14 = vld [vmem:[%s496_s4 + $0x10] sm:$0xff]  ;;  %v265_v15 = vld [vmem:[%s496_s4 + $0x18] sm:$0xff]  ;;  %s372_s29 = scalar_lea.vmem %s310_s0, 16  ;;  %s376_s30 = scalar_lea.vmem %s310_s0, 32 }
   0x8   :  { %152 = vperm.xlu1 %371, %v138_v8   ;;  %v133_v24 = vld [vmem:[%s494_s2 + $0x8] sm:$0xff]  ;;  %v135_v25 = vld [vmem:[%s494_s2 + $0x18] sm:$0xff]  ;;  %p373_p0 = scmp.ne.s32.totalorder %s310_s0, %s372_s29  ;;  %p377_p1 = scmp.lt.s32.totalorder %s310_s0, %s310_s0 }
   0x9   :  { %344 = vmatmul.mubr.msk.f32.gmra.mxu0 %vm30_vm0, %v29_v4  ;;  %p378_p2 = scmp.lt.s32.totalorder %s376_s30, %s372_s29 }
   0xa   :  { %354 = vmatprep.mubr.msk.f32.mxu0 %vm160_vm1, %v132_v5 }
   0xb   :  { %147 = vperm.xlu0 %370, %v137_v10   ;;  %p379_p3 = por %p378_p2, %p377_p1 }
   0xc   :  { %157 = vperm.xlu1 %371, %v139_v11  }
   0xd   :  { %p380_p4 = pnand %p379_p3, %p373_p0 }
   0xf   :  { %268 = vperm.xlu0 %370, %v262_v12  }
  0x10   :  { %273 = vperm.xlu1 %371, %v263_v13  }
  0x13   :  { %278 = vperm.xlu0 %370, %v264_v14  }
  0x14   :  { %283 = vperm.xlu1 %371, %v265_v15  }
  0x82   :  { %v143_v26 = vpop.permute.xlu0 %142 }
  0x83   :  { %v153_v27 = vpop.permute.xlu1 %152 }
  0x86   :  { %v148_v28 = vpop.permute.xlu0 %147 }
  0x87   :  { %v158_v29 = vpop.permute.xlu1 %157 }
  0x8a   :  { %v269_v32 = vpop.permute.xlu0 %268 }
  0x8b   :  { %v274_v40 = vpop.permute.xlu1 %273 }
  0x8e   :  { %v279_v46 = vpop.permute.xlu0 %278 }
  0x8f   :  { %v284_v49 = vpop.permute.xlu1 %283 }
  0xc5   :  { %v342_v16 = vpop.f32.mrf.mxu0 }
  0xc6   :  { %v129_v22 = vmax.f32 %v342_v16, 0.0 }
  0xc7   :  { %v109_v17 = vpop.f32.mrf.mxu0 }
  0xc8   :  { %v128_v23 = vmax.f32 %v109_v17, 0.0 }
  0xc9   :  { %v345_v18 = vpop.f32.mrf.mxu0 }
  0xca   :  { %v131_v19 = vmax.f32 %v345_v18, 0.0 }
  0xcb   :  { %v119_v20 = vpop.f32.mrf.mxu0 }
  0xcc   :  { %v130_v21 = vmax.f32 %v119_v20, 0.0  ;;  %346 = vmatprep.subr.mxu0 %v131_v19  ;;  %360 = vmatprep.subr.mxu1 %v131_v19 }
  0xcd   :  { %347 = vmatpush3.msra.mxu0 %v131_v19  ;;  %364 = vmatpush3.msra.mxu1 %v131_v19 }
  0xce   :  { %348 = vmatprep.subr.mxu0 %v130_v21  ;;  %361 = vmatprep.subr.mxu1 %v130_v21 }
  0xcf   :  { %349 = vmatpush3.msra.mxu0 %v130_v21  ;;  %365 = vmatpush3.msra.mxu1 %v130_v21 }
  0xd0   :  { %350 = vmatprep.subr.mxu0 %v129_v22  ;;  %362 = vmatprep.subr.mxu1 %v129_v22 }
  0xd1   :  { %351 = vmatpush3.msra.mxu0 %v129_v22  ;;  %366 = vmatpush3.msra.mxu1 %v129_v22 }
  0xd2   :  { %352 = vmatprep.subr.mxu0 %v128_v23  ;;  %363 = vmatprep.subr.mxu1 %v128_v23 }
  0xd3   :  { %353 = vmatpush3.msra.mxu0 %v128_v23  ;;  %367 = vmatpush3.msra.mxu1 %v128_v23 }
  0xd4   :  { %355 = vmatmul.mubr.msk.f32.vlgmr.msra.gmra.mxu0 %vm160_vm1, %v133_v24  ;;  %358 = vmatmul.mubr.msk.f32.vlgmr.msra.gmra.mxu1 %vm160_vm1, %v135_v25 }
 0x194   :  { %v356_v30 = vpop.f32.mrf.mxu0  ;;  %v359_v31 = vpop.f32.mrf.mxu1 }
 0x195   :  { %v245_v33 = vadd.f32 %v356_v30, %v148_v28  ;;  %v255_v37 = vadd.f32 %v359_v31, %v158_v29 }
 0x196   :  { %v239_v34 = vpop.f32.mrf.mxu0  ;;  %v249_v35 = vpop.f32.mrf.mxu1 }
 0x197   :  { %v259_v36 = vmax.f32 %v245_v33, 0.0  ;;  %v240_v38 = vadd.f32 %v239_v34, %v143_v26  ;;  %v250_v39 = vadd.f32 %v249_v35, %v153_v27  ;;  %v261_v44 = vmax.f32 %v255_v37, 0.0 }
 0x199   :  { %v258_v41 = vmax.f32 %v240_v38, 0.0  ;;  %v260_v42 = vmax.f32 %v250_v39, 0.0  ;;  %v287_v43 = vmul.f32 %v274_v40, %v259_v36  ;;  %v289_v50 = vmul.f32 %v284_v49, %v261_v44 }
 0x19b   :  { %v286_v45 = vmul.f32 %v269_v32, %v258_v41  ;;  %v288_v48 = vmul.f32 %v279_v46, %v260_v42 }
 0x19d   :  { %v290_v47 = vadd.f32 %v287_v43, %v286_v45 }
 0x19f   :  { %v291_v51 = vadd.f32 %v290_v47, %v288_v48 }
 0x1a1   :  { %v292_v52 = vadd.f32 %v291_v51, %v289_v50 }
 0x1a3   :  { %v293_v53 = vrot.slane %v292_v52, 4 }
 0x1a5   :  { %v294_v54 = vadd.f32 %v293_v53, %v292_v52 }
 0x1a7   :  { %v295_v55 = vrot.slane %v294_v54, 2 }
 0x1a9   :  { %v296_v56 = vadd.f32 %v295_v55, %v294_v54 }
 0x1ab   :  { %v297_v57 = vrot.slane %v296_v56, 1 }
 0x1ad   :  { %v298_v59 = vadd.f32 %v297_v57, %v296_v56 }
 0x1af   :  { %v301_v60 = vadd.f32 %v300_v58, %v298_v59 }
 0x1b1   :  { %302 = vst [vmem:[#allocation3] sm:$0x1] %v301_v60 }
 0x1b2   :  { %383 = shalt.err (!%p380_p4)
}
 0x1b3   :  { %312 = dma.vmem_to_hbm [thread:$0]  %s310_s0, 16, %s498_s6, [#allocation4]  }
 0x1b4   :  { %392 = dma.done.wait [#allocation4], 16  }
 0x1b5   :  { %393 = vsyncadd [#allocation4], 4294967280 }
 0x1b6   :  { %316 = vsyncpa [#allocation4], 1 }

</bundles_post_ra>
